<compile_context>
chip_gen: v6e
topology: v6e:2x2x1
jax: 0.10.0
libtpu: 0.0.40
codegen_flags: <defaults>
</compile_context>

<pallas_src>
import jax
import jax.numpy as jnp
from jax.experimental import pallas as pl
from jax.experimental.pallas import tpu as pltpu


def _round_up(x, m):
    return ((x + m - 1) // m) * m


def nest_mlp_kernel(x_ref, w1_ref, b1_ref, w2_ref, b2_ref, w3_ref, b3_ref, o_ref):
    # In-kernel bf16 cast of x (VPU work, hidden under MXU) — avoids a
    # separate wrapper-side HBM pass over x.
    x = x_ref[...].astype(w1_ref.dtype)
    # net[0]: Linear(20, 64) + ReLU   (bf16 MXU inputs, f32 accumulate)
    h1 = jnp.dot(x, w1_ref[...], preferred_element_type=jnp.float32)
    h1 = jnp.maximum(h1 + b1_ref[...], 0.0)
    # net[2]: Linear(64, 32) + ReLU
    h2 = jnp.dot(h1.astype(w2_ref.dtype), w2_ref[...],
                 preferred_element_type=jnp.float32)
    h2 = jnp.maximum(h2 + b2_ref[...], 0.0)
    # self.linear: Linear(32, 16), no activation
    out = jnp.dot(h2.astype(w3_ref.dtype), w3_ref[...],
                  preferred_element_type=jnp.float32) + b3_ref[...]
    o_ref[...] = out.astype(o_ref.dtype)


def nest_mlp(x, params, *, block_b=4096):
    """x: (B, 20) float32; params: prepared dict (bf16 (in,out) weights, f32 biases)."""
    B = x.shape[0]
    # Batch tile: as large as possible (amortizes ~0.35us/step overhead), but
    #  * 16-aligned (bf16 sublane packing),
    #  * capped at ceil(B/2) so grid_b >= 2 when B is large enough — keeps
    #    both v7x TensorCores busy under dimension_semantics=("parallel",).
    # At block_b=4096 the double-buffered, lane-padded x+out tiles are ~8 MiB,
    # inside v5e's 16 MiB scoped-VMEM default; raise vmem_limit_bytes if you
    # push block_b much higher.
    TB = min(block_b, max(16, _round_up(pl.cdiv(B, 2), 16)))
    grid_b = pl.cdiv(B, TB)

    const = lambda i: (0, 0)  # weights/biases resident across all grid steps
    return pl.pallas_call(
        nest_mlp_kernel,
        out_shape=jax.ShapeDtypeStruct((B, 16), jnp.float32),
        grid=(grid_b,),
        in_specs=[
            pl.BlockSpec((TB, 20), lambda i: (i, 0)),   # x: batch-tiled, f32
            pl.BlockSpec((20, 64), const),              # w1 (bf16)
            pl.BlockSpec((1, 64), const),               # b1 (f32)
            pl.BlockSpec((64, 32), const),              # w2 (bf16)
            pl.BlockSpec((1, 32), const),               # b2 (f32)
            pl.BlockSpec((32, 16), const),              # w3 (bf16)
            pl.BlockSpec((1, 16), const),               # b3 (f32)
        ],
        out_specs=pl.BlockSpec((TB, 16), lambda i: (i, 0)),
        compiler_params=pltpu.CompilerParams(
            dimension_semantics=("parallel",),          # v7x: shard over 2 TCs
        ),
    )(x, params["w1"], params["b1"], params["w2"], params["b2"],
      params["w3"], params["b3"])


def init_params(key):
    """Deterministic init mimicking PyTorch nn.Linear default U(-1/sqrt(fan_in), +)."""
    def linear_init(k, fan_in, fan_out):
        kw, kb = jax.random.split(k)
        bound = 1.0 / jnp.sqrt(fan_in)
        # stored already transposed to (in, out) for the kernel
        w = jax.random.uniform(kw, (fan_in, fan_out), jnp.float32, -bound, bound)
        b = jax.random.uniform(kb, (1, fan_out), jnp.float32, -bound, bound)
        return w, b

    k1, k2, k3 = jax.random.split(key, 3)
    w1, b1 = linear_init(k1, 20, 64)
    w2, b2 = linear_init(k2, 64, 32)
    w3, b3 = linear_init(k3, 32, 16)
    return dict(w1=w1, b1=b1, w2=w2, b2=b2, w3=w3, b3=b3)


def prepare_params(params):
    """One-time prep (hoisted off the per-call hot path): weights -> bf16
    (native MXU input dtype, halves resident/DMA bytes); biases stay f32."""
    bf16 = jnp.bfloat16
    return dict(
        w1=params["w1"].astype(bf16), b1=params["b1"],
        w2=params["w2"].astype(bf16), b2=params["b2"],
        w3=params["w3"].astype(bf16), b3=params["b3"],
    )


def nest_mlp_ref_f32(x, p):
    """Full-f32 reference (semantics of the PyTorch module)."""
    h1 = jnp.maximum(x @ p["w1"] + p["b1"], 0.0)
    h2 = jnp.maximum(h1 @ p["w2"] + p["b2"], 0.0)
    return h2 @ p["w3"] + p["b3"]


def nest_mlp_ref_mixed(x, p):
    """Reference using the kernel's exact mixed precision (bf16 in, f32 acc)."""
    bf = jnp.bfloat16
    h1 = jnp.dot(x.astype(bf), p["w1"].astype(bf),
                 preferred_element_type=jnp.float32)
    h1 = jnp.maximum(h1 + p["b1"], 0.0)
    h2 = jnp.dot(h1.astype(bf), p["w2"].astype(bf),
                 preferred_element_type=jnp.float32)
    h2 = jnp.maximum(h2 + p["b2"], 0.0)
    return jnp.dot(h2.astype(bf), p["w3"].astype(bf),
                   preferred_element_type=jnp.float32) + p["b3"]


if __name__ == "__main__":
    key = jax.random.PRNGKey(0)
    kx, kp = jax.random.split(key)
    # matches `X = torch.rand(2, 20)` — uniform [0, 1), shape (2, 20)
    x = jax.random.uniform(kx, (2, 20), jnp.float32)
    params = init_params(kp)
    prepped = prepare_params(params)   # one-time bf16 weight cast

    out = jax.block_until_ready(nest_mlp(x, prepped))
    assert out.shape == (2, 16), out.shape
    assert out.dtype == jnp.float32, out.dtype

    # Tight check vs a reference computed in the kernel's mixed precision.
    ref_mixed = nest_mlp_ref_mixed(x, params)
    assert jnp.allclose(out, ref_mixed, atol=1e-4, rtol=1e-4), \
        "mismatch vs mixed-precision JAX reference"

    # Loose sanity check vs full-f32 module semantics (bf16 cast error only).
    ref_f32 = nest_mlp_ref_f32(x, params)
    assert jnp.allclose(out, ref_f32, atol=5e-2, rtol=5e-2), \
        "mismatch vs f32 JAX reference"

    print("KERNEL_OK")
</pallas_src>

<mosaic_0001>
module attributes {stable_mosaic.version = 11 : i64} {
  func.func @nest_mlp_kernel(%arg0: i32, %arg1: memref<16x20xf32, #tpu.memory_space<vmem>>, %arg2: memref<20x64xbf16, #tpu.memory_space<vmem>>, %arg3: memref<1x64xf32, #tpu.memory_space<vmem>>, %arg4: memref<64x32xbf16, #tpu.memory_space<vmem>>, %arg5: memref<1x32xf32, #tpu.memory_space<vmem>>, %arg6: memref<32x16xbf16, #tpu.memory_space<vmem>>, %arg7: memref<1x16xf32, #tpu.memory_space<vmem>>, %arg8: memref<16x16xf32, #tpu.memory_space<vmem>>) attributes {dimension_semantics = [#tpu.dimension_semantics<parallel>], iteration_bounds = array<i64: 1>, scalar_prefetch = 0 : i64, scratch_operands = 0 : i64, tpu.core_type = #tpu.core_type<tc>, window_params = [{transform_indices = @transform_0, window_bounds = array<i64: 16, 20>}, {pipeline_mode = #tpu.pipeline_mode<synchronous>, transform_indices = @transform_1, window_bounds = array<i64: 20, 64>}, {pipeline_mode = #tpu.pipeline_mode<synchronous>, transform_indices = @transform_2, window_bounds = array<i64: 1, 64>}, {pipeline_mode = #tpu.pipeline_mode<synchronous>, transform_indices = @transform_3, window_bounds = array<i64: 64, 32>}, {pipeline_mode = #tpu.pipeline_mode<synchronous>, transform_indices = @transform_4, window_bounds = array<i64: 1, 32>}, {pipeline_mode = #tpu.pipeline_mode<synchronous>, transform_indices = @transform_5, window_bounds = array<i64: 32, 16>}, {pipeline_mode = #tpu.pipeline_mode<synchronous>, transform_indices = @transform_6, window_bounds = array<i64: 1, 16>}, {transform_indices = @transform_7, window_bounds = array<i64: 16, 16>}]} {
    %c0 = arith.constant 0 : index
    %c0_0 = arith.constant 0 : index
    %0 = vector.load %arg1[%c0, %c0_0] : memref<16x20xf32, #tpu.memory_space<vmem>>, vector<16x20xf32>
    %1 = arith.truncf %0 : vector<16x20xf32> to vector<16x20xbf16>
    %c0_1 = arith.constant 0 : index
    %c0_2 = arith.constant 0 : index
    %2 = vector.load %arg2[%c0_1, %c0_2] : memref<20x64xbf16, #tpu.memory_space<vmem>>, vector<20x64xbf16>
    %cst = arith.constant dense<0.000000e+00> : vector<16x64xf32>
    %3 = tpu.matmul %1, %2, %cst {dimension_numbers = #tpu.dot_dimension_numbers<[1], [0], [0], [1], [0, 0, 1, 1], [], []>} : vector<16x20xbf16>, vector<20x64xbf16>, vector<16x64xf32> -> vector<16x64xf32>
    %c0_3 = arith.constant 0 : index
    %c0_4 = arith.constant 0 : index
    %4 = vector.load %arg3[%c0_3, %c0_4] : memref<1x64xf32, #tpu.memory_space<vmem>>, vector<1x64xf32>
    %5 = vector.broadcast %4 : vector<1x64xf32> to vector<16x64xf32>
    %6 = arith.addf %3, %5 : vector<16x64xf32>
    %cst_5 = arith.constant 0.000000e+00 : f32
    %7 = vector.broadcast %cst_5 : f32 to vector<16x64xf32>
    %8 = arith.maximumf %6, %7 : vector<16x64xf32>
    %9 = arith.truncf %8 : vector<16x64xf32> to vector<16x64xbf16>
    %c0_6 = arith.constant 0 : index
    %c0_7 = arith.constant 0 : index
    %10 = vector.load %arg4[%c0_6, %c0_7] : memref<64x32xbf16, #tpu.memory_space<vmem>>, vector<64x32xbf16>
    %cst_8 = arith.constant dense<0.000000e+00> : vector<16x32xf32>
    %11 = tpu.matmul %9, %10, %cst_8 {dimension_numbers = #tpu.dot_dimension_numbers<[1], [0], [0], [1], [0, 0, 1, 1], [], []>} : vector<16x64xbf16>, vector<64x32xbf16>, vector<16x32xf32> -> vector<16x32xf32>
    %c0_9 = arith.constant 0 : index
    %c0_10 = arith.constant 0 : index
    %12 = vector.load %arg5[%c0_9, %c0_10] : memref<1x32xf32, #tpu.memory_space<vmem>>, vector<1x32xf32>
    %13 = vector.broadcast %12 : vector<1x32xf32> to vector<16x32xf32>
    %14 = arith.addf %11, %13 : vector<16x32xf32>
    %cst_11 = arith.constant 0.000000e+00 : f32
    %15 = vector.broadcast %cst_11 : f32 to vector<16x32xf32>
    %16 = arith.maximumf %14, %15 : vector<16x32xf32>
    %17 = arith.truncf %16 : vector<16x32xf32> to vector<16x32xbf16>
    %c0_12 = arith.constant 0 : index
    %c0_13 = arith.constant 0 : index
    %18 = vector.load %arg6[%c0_12, %c0_13] : memref<32x16xbf16, #tpu.memory_space<vmem>>, vector<32x16xbf16>
    %cst_14 = arith.constant dense<0.000000e+00> : vector<16x16xf32>
    %19 = tpu.matmul %17, %18, %cst_14 {dimension_numbers = #tpu.dot_dimension_numbers<[1], [0], [0], [1], [0, 0, 1, 1], [], []>} : vector<16x32xbf16>, vector<32x16xbf16>, vector<16x16xf32> -> vector<16x16xf32>
    %c0_15 = arith.constant 0 : index
    %c0_16 = arith.constant 0 : index
    %20 = vector.load %arg7[%c0_15, %c0_16] : memref<1x16xf32, #tpu.memory_space<vmem>>, vector<1x16xf32>
    %21 = vector.broadcast %20 : vector<1x16xf32> to vector<16x16xf32>
    %22 = arith.addf %19, %21 : vector<16x16xf32>
    %c0_17 = arith.constant 0 : index
    %c0_18 = arith.constant 0 : index
    %23 = vector.load %arg8[%c0_17, %c0_18] : memref<16x16xf32, #tpu.memory_space<vmem>>, vector<16x16xf32>
    tpu.vector_store %arg8[%c0_17, %c0_18], %22 {strides = array<i32>} : memref<16x16xf32, #tpu.memory_space<vmem>>, vector<16x16xf32>,
    return
  }
  func.func @transform_0(%arg0: i32) -> (i32, i32) {
    %c0_i32 = arith.constant 0 : i32
    %c0_i32_0 = arith.constant 0 : i32
    return %arg0, %c0_i32 : i32, i32
  }
  func.func @transform_1(%arg0: i32) -> (i32, i32) {
    %c0_i32 = arith.constant 0 : i32
    %c0_i32_0 = arith.constant 0 : i32
    %c0_i32_1 = arith.constant 0 : i32
    return %c0_i32, %c0_i32_0 : i32, i32
  }
  func.func @transform_2(%arg0: i32) -> (i32, i32) {
    %c0_i32 = arith.constant 0 : i32
    %c0_i32_0 = arith.constant 0 : i32
    %c0_i32_1 = arith.constant 0 : i32
    return %c0_i32, %c0_i32_0 : i32, i32
  }
  func.func @transform_3(%arg0: i32) -> (i32, i32) {
    %c0_i32 = arith.constant 0 : i32
    %c0_i32_0 = arith.constant 0 : i32
    %c0_i32_1 = arith.constant 0 : i32
    return %c0_i32, %c0_i32_0 : i32, i32
  }
  func.func @transform_4(%arg0: i32) -> (i32, i32) {
    %c0_i32 = arith.constant 0 : i32
    %c0_i32_0 = arith.constant 0 : i32
    %c0_i32_1 = arith.constant 0 : i32
    return %c0_i32, %c0_i32_0 : i32, i32
  }
  func.func @transform_5(%arg0: i32) -> (i32, i32) {
    %c0_i32 = arith.constant 0 : i32
    %c0_i32_0 = arith.constant 0 : i32
    %c0_i32_1 = arith.constant 0 : i32
    return %c0_i32, %c0_i32_0 : i32, i32
  }
  func.func @transform_6(%arg0: i32) -> (i32, i32) {
    %c0_i32 = arith.constant 0 : i32
    %c0_i32_0 = arith.constant 0 : i32
    %c0_i32_1 = arith.constant 0 : i32
    return %c0_i32, %c0_i32_0 : i32, i32
  }
  func.func @transform_7(%arg0: i32) -> (i32, i32) {
    %c0_i32 = arith.constant 0 : i32
    %c0_i32_0 = arith.constant 0 : i32
    return %arg0, %c0_i32 : i32, i32
  }
}

</mosaic_0001>

<bundles_post_ra>
// kernel: tpu_custom_call.1
= control target key start
LH: loop header
LB: loop body
LE: loop exit
PB: predicated region body
PF: predicated region fallthrough
CT: control target
= control target key end

     0   :  { %12 = vsyncpa [#allocation3], 0  ;;  %vm54_vm0 = vcmask 1041408   ;;  %v364_v0 = vmov 0.0   ;;  %vm365_vm1 = vmmov 0   ;;  %vm50_vm2 = vcmask 162816   ;;  %s451_s0 = inlined_call_operand.vmem [shape: f32[2,20], index: 0, kind: input, shape index: {}]   ;;  %s452_s1 = inlined_call_operand.vmem [shape: bf16[20,64], index: 1, kind: input, shape index: {}]   ;;  %s453_s2 = inlined_call_operand.vmem [shape: f32[1,64], index: 2, kind: input, shape index: {}]   ;;  %s454_s3 = inlined_call_operand.vmem [shape: bf16[64,32], index: 3, kind: input, shape index: {}]   ;;  %s455_s4 = inlined_call_operand.vmem [shape: f32[1,32], index: 4, kind: input, shape index: {}]   ;;  %s456_s5 = inlined_call_operand.vmem [shape: bf16[32,16], index: 5, kind: input, shape index: {}]   ;;  %s457_s6 = inlined_call_operand.vmem [shape: f32[1,16], index: 6, kind: input, shape index: {}]   ;;  %s458_s7 = inlined_call_operand.hbm [shape: f32[2,16], index: 7, kind: output, shape index: {}]  }
   0x1   :  { %301 = vmatprep.subr.bf16.mxu0 %v364_v0  ;;  %v334_v1 = vld [vmem:[%s452_s1 + $0x8] ss:$0 sps:$4 sm:$0x33]   ;;  %309 = vmatprep.subr.bf16.mxu1 %v364_v0  ;;  %v335_v2 = vld [vmem:[%s452_s1] sm:$0xff]   ;;  %v336_v5 = vld [vmem:[%s454_s3 + $0x18] sm:$0xff]   ;;  %vm141_vm3 = vcmask 523264  }
   0x2   :  { %v28_v3 = vld [vmem:[%s451_s0] sm:$0xff]  ;;  %v56_v4 = vsel %vm54_vm0, %v334_v1, 0  ;;  %305 = vmatprep.mubr.msk.bf16.mxu0 %vm365_vm1, %v364_v0  ;;  %317 = vmatprep.mubr.msk.bf16.mxu1 %vm365_vm1, %v364_v0  ;;  %v29_v6 = vld [vmem:[%s451_s0 + $0x8] sm:$0xff]  ;;  %v337_v8 = vld [vmem:[%s454_s3 + $0x10] sm:$0xff]   ;;  %vm212_vm4 = vcmask 261120   ;;  %vm257_vm5 = vcmask 130048  }
   0x3   :  { %302 = vmatpush3.bf16.msra.mxu0 %v56_v4  ;;  %310 = vmatpush3.bf16.msra.mxu1 %v336_v5  ;;  %v30_v7 = vpack.c.bf16 %v29_v6, %v28_v3  ;;  %v338_v9 = vld [vmem:[%s454_s3 + $0x8] sm:$0xff]   ;;  %v339_v10 = vld [vmem:[%s454_s3] sm:$0xff]  }
   0x4   :  { %303 = vmatprep.subr.bf16.mxu0 %v364_v0  ;;  %311 = vmatprep.subr.bf16.mxu1 %v364_v0  ;;  %v276_v11 = vld [vmem:[%s453_s2] ss:$0 sm:$0xff]  ;;  %v340_v21 = vld [vmem:[%s456_s5 + $0x8] sm:$0xff]  }
   0x5   :  { %v341_v22 = vld [vmem:[%s456_s5] sm:$0xff]  }
   0x6   :  { %v280_v23 = vld [vmem:[%s455_s4] ss:$0 sm:$0xff] }
   0x7   :  { %304 = vmatpush3.bf16.msra.mxu0 %v335_v2  ;;  %312 = vmatpush3.bf16.msra.mxu1 %v337_v8  ;;  %v286_v33 = vld [vmem:[%s457_s6] ss:$0 sm:$0xff] }
   0x8   :  { %321 = vmatprep.subr.bf16.mxu0 %v364_v0  ;;  %313 = vmatprep.subr.bf16.mxu1 %v364_v0 }
   0xa   :  { %306 = vmatmul.mubr.msk.bf16.vlgmr.msra.gmra.mxu0 %vm50_vm2, %v30_v7 }
   0xb   :  { %325 = vmatprep.mubr.msk.bf16.mxu0 %vm365_vm1, %v364_v0  ;;  %314 = vmatpush3.bf16.msra.mxu1 %v338_v9 }
   0xc   :  { %315 = vmatprep.subr.bf16.mxu1 %v364_v0  ;;  %322 = vmatpush3.bf16.msra.mxu0 %v340_v21 }
   0xd   :  { %323 = vmatprep.subr.bf16.mxu0 %v364_v0 }
   0xf   :  { %316 = vmatpush3.bf16.msra.mxu1 %v339_v10 }
  0x10   :  { %324 = vmatpush3.bf16.msra.mxu0 %v341_v22 }
  0xca   :  { %v92_v12 = vpop.f32.mrf.mxu0 }
  0xcb   :  { %v93_v14 = vadd.f32 %v276_v11, %v92_v12 }
  0xcc   :  { %v307_v13 = vpop.f32.mrf.mxu0 }
  0xcd   :  { %v99_v18 = vmax.f32 %v93_v14, 0.0 }
  0xce   :  { %v95_v15 = vpop.f32.mrf.mxu0 }
  0xcf   :  { %v96_v16 = vadd.f32 %v276_v11, %v95_v15 }
  0xd0   :  { %v308_v17 = vpop.f32.mrf.mxu0 }
  0xd1   :  { %v100_v19 = vmax.f32 %v96_v16, 0.0 }
  0xd3   :  { %v101_v20 = vpack.c.bf16 %v100_v19, %v99_v18 }
  0xd5   :  { %318 = vmatmul.mubr.msk.bf16.vlgmr.msra.gmra.mxu1 %vm141_vm3, %v101_v20 }
 0x195   :  { %v179_v24 = vpop.f32.mrf.mxu1 }
 0x196   :  { %v180_v26 = vadd.f32 %v280_v23, %v179_v24 }
 0x197   :  { %v319_v25 = vpop.f32.mrf.mxu1 }
 0x198   :  { %v186_v30 = vmax.f32 %v180_v26, 0.0 }
 0x199   :  { %v182_v27 = vpop.f32.mrf.mxu1 }
 0x19a   :  { %v183_v28 = vadd.f32 %v280_v23, %v182_v27 }
 0x19b   :  { %v320_v29 = vpop.f32.mrf.mxu1 }
 0x19c   :  { %v187_v31 = vmax.f32 %v183_v28, 0.0 }
 0x19e   :  { %v188_v32 = vpack.c.bf16 %v187_v31, %v186_v30 }
 0x1a0   :  { %326 = vmatmul.mubr.msk.bf16.vlgmr.msra.gmra.mxu0 %vm212_vm4, %v188_v32 }
 0x260   :  { %v250_v34 = vpop.f32.mrf.mxu0 }
 0x261   :  { %v251_v35 = vadd.f32 %v286_v33, %v250_v34 }
 0x262   :  { %v327_v36 = vpop.f32.mrf.mxu0 }
 0x263   :  { %258 = vst.msk [vmem:[#allocation2] sm:$0xff] %vm257_vm5, %v251_v35 }
 0x264   :  { %v253_v37 = vpop.f32.mrf.mxu0 }
 0x265   :  { %v254_v38 = vadd.f32 %v286_v33, %v253_v37 }
 0x266   :  { %v328_v39 = vpop.f32.mrf.mxu0 }
 0x267   :  { %259 = vst.msk [vmem:[#allocation2 + $0x8] sm:$0xff] %vm257_vm5, %v254_v38 }
 0x268   :  { %264 = vsyncadd [#allocation3], 224  ;;  %s366_s4 = smov [#allocation2]  }
 0x269   :  { %s265_s5 = sshll.u32 %s366_s4, 4  ;;  %s266_s5 = int_to_ptr.vmem [resolvable:$true] %s265_s5 }
 0x26a   :  { %s342_s23 = scalar_lea.vmem %s266_s5, 32  ;;  %s346_s24 = scalar_lea.vmem %s266_s5, 256 }
 0x26b   :  { %p343_p0 = scmp.ne.s32.totalorder %s266_s5, %s342_s23  ;;  %p347_p1 = scmp.lt.s32.totalorder %s266_s5, %s266_s5 }
 0x26c   :  { %p348_p2 = scmp.lt.s32.totalorder %s346_s24, %s342_s23 }
 0x26e   :  { %p349_p3 = por %p348_p2, %p347_p1 }
 0x270   :  { %p350_p4 = pnand %p349_p3, %p343_p0 }
 0x272   :  { %353 = shalt.err (!%p350_p4)
}
 0x273   :  { %s367_s6 = smov 32   ;;  %s368_s25 = smov 2  }
 0x274   :  { %271 = dma.vmem_to_hbm [thread:$0]  %s266_s5, 32, %s458_s7, [#allocation3], %s367_s6, %s367_s6, %s368_s25  }
 0x275   :  { %362 = dma.done.wait [#allocation3], 256  }
 0x276   :  { %363 = vsyncadd [#allocation3], 4294967040 }
 0x277   :  { %275 = vsyncpa [#allocation3], 1 }

</bundles_post_ra>
